<compile_context>
chip_gen: v7x
topology: tpu7x:2x2x1
jax: 0.10.0
libtpu: 0.0.40
codegen_flags: <defaults>
</compile_context>

<pallas_src>
import numpy as np
import jax
import jax.numpy as jnp
from jax import lax
from jax.experimental import pallas as pl
from jax.experimental.pallas import tpu as pltpu


def _round_up(n, m):
    return ((n + m - 1) // m) * m


# ----------------------------- Pallas kernel ---------------------------------

def global_abstraction_pallas(x, pos, batch2d, w1x, w1p, b1, w2, b2, *,
                              num_batches, tn=2048):
    """Fused per-point MLP + global max pool.

    x:       [N, C_in] f32
    pos:     [N, 3]    f32
    batch2d: [N, 1]    int32 (values in [0, num_batches))
    w1x: [C_in, H] bf16, w1p: [3, H] bf16, b1: [1, H] f32
    w2:  [H, C_out] bf16, b2: [1, C_out] f32
    Returns [num_batches, C_out] f32.
    """
    N, C_in = x.shape
    H = w1x.shape[1]
    C_out = w2.shape[1]
    B = num_batches

    # Large point tile (amortizes ~0.35us per-grid-step overhead), 16-aligned,
    # clamped to the (16-aligned) problem size.  No host-side padding.
    tn = max(16, min(_round_up(tn, 16), _round_up(N, 16)))
    grid_n = pl.cdiv(N, tn)

    def kernel(x_ref, pos_ref, b_ref, w1x_ref, w1p_ref, b1_ref, w2_ref,
               b2_ref, out_ref):
        # Per-point MLP: concat folded in as two split-W1 dots (no [N, C_in+3]
        # tensor ever hits HBM).  bf16 MXU operands, f32 accumulation.
        xb = x_ref[...].astype(jnp.bfloat16)
        pb = pos_ref[...].astype(jnp.bfloat16)
        h = jnp.dot(xb, w1x_ref[...], preferred_element_type=jnp.float32)
        h = h + jnp.dot(pb, w1p_ref[...], preferred_element_type=jnp.float32)
        h = jnp.maximum(h + b1_ref[...], 0.0)
        h = jnp.dot(h.astype(jnp.bfloat16), w2_ref[...],
                    preferred_element_type=jnp.float32)
        h = jnp.maximum(h + b2_ref[...], 0.0)                  # [tn, C_out] f32

        # Row-validity mask for the ragged last tile: rows >= N hold garbage
        # (Pallas OOB block fill) and must never reach the max.
        row = lax.broadcasted_iota(jnp.int32, (tn, 1), 0)
        valid = row < (N - pl.program_id(0) * tn)               # [tn, 1] bool
        bidx = b_ref[...]                                       # [tn, 1] int32

        # Per-batch segment max via -inf select (exact global_max_pool
        # semantics; does not rely on the MLP ending in ReLU).  B is small &
        # static -> fully unrolled; rows are stored directly (no concatenate).
        for b in range(B):
            keep = jnp.logical_and(valid, bidx == b)            # [tn, 1]
            sel = jnp.where(keep, h, -jnp.inf)                  # [tn, C_out]
            out_ref[0, b:b + 1, :] = jnp.max(sel, axis=0, keepdims=True)

    flops = 2 * N * (C_in * H + 3 * H + H * C_out)
    bytes_accessed = (N * (C_in + 3) * 4 + N * 4                # f32 x/pos + i32 batch
                      + ((C_in + 3) * H + H * C_out) * 2        # bf16 weights
                      + (H + C_out) * 4                         # f32 biases
                      + grid_n * B * C_out * 4)                 # f32 partials out

    partials = pl.pallas_call(
        kernel,
        out_shape=jax.ShapeDtypeStruct((grid_n, B, C_out), jnp.float32),
        grid_spec=pltpu.PrefetchScalarGridSpec(
            num_scalar_prefetch=0,
            grid=(grid_n,),
            in_specs=[
                pl.BlockSpec((tn, C_in), lambda i: (i, 0)),
                pl.BlockSpec((tn, 3), lambda i: (i, 0)),
                pl.BlockSpec((tn, 1), lambda i: (i, 0)),
                pl.BlockSpec((C_in, H), lambda i: (0, 0)),
                pl.BlockSpec((3, H), lambda i: (0, 0)),
                pl.BlockSpec((1, H), lambda i: (0, 0)),
                pl.BlockSpec((H, C_out), lambda i: (0, 0)),
                pl.BlockSpec((1, C_out), lambda i: (0, 0)),
            ],
            out_specs=pl.BlockSpec((1, B, C_out), lambda i: (i, 0, 0)),
        ),
        compiler_params=pltpu.CompilerParams(
            dimension_semantics=("parallel",)),
        cost_estimate=pl.CostEstimate(
            flops=flops, transcendentals=0, bytes_accessed=bytes_accessed),
    )(x, pos, batch2d, w1x, w1p, b1, w2, b2)

    # Tiny [grid_n, B, C_out] cross-tile max stays in XLA so the grid axis can
    # remain "parallel" (megacore-shardable on v7x); on v5e/v6e it is noise.
    return jnp.max(partials, axis=0)


# ------------------------------ module wrapper --------------------------------

def global_abstraction_forward(x, pos, batch, params, *, num_batches, tn=2048):
    """Full GlobalAbstractionLayer.forward: returns [num_batches, C_out] f32."""
    w1, b1, w2, b2 = params
    c_in = x.shape[1]
    # Split W1 host-side (tiny, VMEM-resident anyway) so the concat([x, pos])
    # never has to be materialized:  x @ W1[:c_in] + pos @ W1[c_in:].
    w1x = w1[:c_in].astype(jnp.bfloat16)
    w1p = w1[c_in:].astype(jnp.bfloat16)
    return global_abstraction_pallas(
        x.astype(jnp.float32), pos.astype(jnp.float32),
        batch.astype(jnp.int32).reshape(-1, 1),
        w1x, w1p, b1.astype(jnp.float32),
        w2.astype(jnp.bfloat16), b2.astype(jnp.float32),
        num_batches=num_batches, tn=tn)


def _reference(x, pos, batch, params, num_batches):
    """Pure-JAX reference with matched bf16/f32 numerics and true -inf segment max."""
    w1, b1, w2, b2 = params
    feats = jnp.concatenate([x, pos], axis=1).astype(jnp.bfloat16)
    h = jnp.dot(feats, w1.astype(jnp.bfloat16),
                preferred_element_type=jnp.float32)
    h = jnp.maximum(h + b1, 0.0)
    h = jnp.dot(h.astype(jnp.bfloat16), w2.astype(jnp.bfloat16),
                preferred_element_type=jnp.float32)
    h = jnp.maximum(h + b2, 0.0)                              # [N, C_out]
    onehot = batch[:, None] == jnp.arange(num_batches, dtype=batch.dtype)[None, :]
    sel = jnp.where(onehot[:, :, None], h[:, None, :], -jnp.inf)
    return jnp.max(sel, axis=0)                               # [B, C_out]


# --------------------------------- driver -------------------------------------

if __name__ == "__main__":
    key = jax.random.PRNGKey(0)
    k_pos, k_x, k_w1, k_b1, k_w2, k_b2 = jax.random.split(key, 6)

    # Small point cloud: 2 batches x 20 points (N=40 exercises a ragged tile),
    # 4 input channels.
    B, N_PER, C_IN = 2, 20, 4
    N = B * N_PER
    HIDDEN, C_OUT = 32, 32
    D_IN = C_IN + 3

    pos = jax.random.uniform(k_pos, (N, 3), dtype=jnp.float32)
    x = jax.random.normal(k_x, (N, C_IN), dtype=jnp.float32)
    batch = jnp.repeat(jnp.arange(B, dtype=jnp.int32), N_PER)

    # mlp = Linear(7, 32) + ReLU + Linear(32, 32) + ReLU (deterministic params).
    w1 = jax.random.normal(k_w1, (D_IN, HIDDEN), dtype=jnp.float32) * 0.1
    b1 = jax.random.normal(k_b1, (1, HIDDEN), dtype=jnp.float32) * 0.01
    w2 = jax.random.normal(k_w2, (HIDDEN, C_OUT), dtype=jnp.float32) * 0.1
    b2 = jax.random.normal(k_b2, (1, C_OUT), dtype=jnp.float32) * 0.01
    params = (w1, b1, w2, b2)

    ref = _reference(x, pos, batch, params, B)

    # Default large tile (clamps to a single ragged tile at this size).
    out = global_abstraction_forward(x, pos, batch, params, num_batches=B)
    out = jax.block_until_ready(out)
    np.testing.assert_allclose(np.asarray(out), np.asarray(ref),
                               rtol=1e-3, atol=1e-3)

    # Multi-tile path with a ragged last tile (tn=16 -> grid of 3 for N=40).
    out_tiled = global_abstraction_forward(x, pos, batch, params,
                                           num_batches=B, tn=16)
    out_tiled = jax.block_until_ready(out_tiled)
    np.testing.assert_allclose(np.asarray(out_tiled), np.asarray(ref),
                               rtol=1e-3, atol=1e-3)

    assert out.shape == (B, C_OUT)
    print("KERNEL_OK")
</pallas_src>

<mosaic_0001>
module attributes {stable_mosaic.version = 11 : i64} {
  func.func @kernel(%arg0: i32, %arg1: memref<48x4xf32, #tpu.memory_space<vmem>>, %arg2: memref<48x3xf32, #tpu.memory_space<vmem>>, %arg3: memref<48x1xi32, #tpu.memory_space<vmem>>, %arg4: memref<4x32xbf16, #tpu.memory_space<vmem>>, %arg5: memref<3x32xbf16, #tpu.memory_space<vmem>>, %arg6: memref<1x32xf32, #tpu.memory_space<vmem>>, %arg7: memref<32x32xbf16, #tpu.memory_space<vmem>>, %arg8: memref<1x32xf32, #tpu.memory_space<vmem>>, %arg9: memref<1x2x32xf32, #tpu.memory_space<vmem>>) attributes {dimension_semantics = [#tpu.dimension_semantics<parallel>], iteration_bounds = array<i64: 1>, scalar_prefetch = 0 : i64, scratch_operands = 0 : i64, tpu.core_type = #tpu.core_type<tc>, window_params = [{transform_indices = @transform_0, window_bounds = array<i64: 48, 4>}, {transform_indices = @transform_1, window_bounds = array<i64: 48, 3>}, {transform_indices = @transform_2, window_bounds = array<i64: 48, 1>}, {pipeline_mode = #tpu.pipeline_mode<synchronous>, transform_indices = @transform_3, window_bounds = array<i64: 4, 32>}, {pipeline_mode = #tpu.pipeline_mode<synchronous>, transform_indices = @transform_4, window_bounds = array<i64: 3, 32>}, {pipeline_mode = #tpu.pipeline_mode<synchronous>, transform_indices = @transform_5, window_bounds = array<i64: 1, 32>}, {pipeline_mode = #tpu.pipeline_mode<synchronous>, transform_indices = @transform_6, window_bounds = array<i64: 32, 32>}, {pipeline_mode = #tpu.pipeline_mode<synchronous>, transform_indices = @transform_7, window_bounds = array<i64: 1, 32>}, {transform_indices = @transform_8, window_bounds = array<i64: 1, 2, 32>}]} {
    %c0 = arith.constant 0 : index
    %c0_0 = arith.constant 0 : index
    %0 = vector.load %arg1[%c0, %c0_0] : memref<48x4xf32, #tpu.memory_space<vmem>>, vector<48x4xf32>
    %1 = arith.truncf %0 : vector<48x4xf32> to vector<48x4xbf16>
    %c0_1 = arith.constant 0 : index
    %c0_2 = arith.constant 0 : index
    %2 = vector.load %arg2[%c0_1, %c0_2] : memref<48x3xf32, #tpu.memory_space<vmem>>, vector<48x3xf32>
    %3 = arith.truncf %2 : vector<48x3xf32> to vector<48x3xbf16>
    %c0_3 = arith.constant 0 : index
    %c0_4 = arith.constant 0 : index
    %4 = vector.load %arg4[%c0_3, %c0_4] : memref<4x32xbf16, #tpu.memory_space<vmem>>, vector<4x32xbf16>
    %cst = arith.constant dense<0.000000e+00> : vector<48x32xf32>
    %5 = tpu.matmul %1, %4, %cst {dimension_numbers = #tpu.dot_dimension_numbers<[1], [0], [0], [1], [0, 0, 1, 1], [], []>} : vector<48x4xbf16>, vector<4x32xbf16>, vector<48x32xf32> -> vector<48x32xf32>
    %c0_5 = arith.constant 0 : index
    %c0_6 = arith.constant 0 : index
    %6 = vector.load %arg5[%c0_5, %c0_6] : memref<3x32xbf16, #tpu.memory_space<vmem>>, vector<3x32xbf16>
    %cst_7 = arith.constant dense<0.000000e+00> : vector<48x32xf32>
    %7 = tpu.matmul %3, %6, %cst_7 {dimension_numbers = #tpu.dot_dimension_numbers<[1], [0], [0], [1], [0, 0, 1, 1], [], []>} : vector<48x3xbf16>, vector<3x32xbf16>, vector<48x32xf32> -> vector<48x32xf32>
    %8 = arith.addf %5, %7 : vector<48x32xf32>
    %c0_8 = arith.constant 0 : index
    %c0_9 = arith.constant 0 : index
    %9 = vector.load %arg6[%c0_8, %c0_9] : memref<1x32xf32, #tpu.memory_space<vmem>>, vector<1x32xf32>
    %10 = vector.broadcast %9 : vector<1x32xf32> to vector<48x32xf32>
    %11 = arith.addf %8, %10 : vector<48x32xf32>
    %cst_10 = arith.constant 0.000000e+00 : f32
    %12 = vector.broadcast %cst_10 : f32 to vector<48x32xf32>
    %13 = arith.maximumf %11, %12 : vector<48x32xf32>
    %14 = arith.truncf %13 : vector<48x32xf32> to vector<48x32xbf16>
    %c0_11 = arith.constant 0 : index
    %c0_12 = arith.constant 0 : index
    %15 = vector.load %arg7[%c0_11, %c0_12] : memref<32x32xbf16, #tpu.memory_space<vmem>>, vector<32x32xbf16>
    %cst_13 = arith.constant dense<0.000000e+00> : vector<48x32xf32>
    %16 = tpu.matmul %14, %15, %cst_13 {dimension_numbers = #tpu.dot_dimension_numbers<[1], [0], [0], [1], [0, 0, 1, 1], [], []>} : vector<48x32xbf16>, vector<32x32xbf16>, vector<48x32xf32> -> vector<48x32xf32>
    %c0_14 = arith.constant 0 : index
    %c0_15 = arith.constant 0 : index
    %17 = vector.load %arg8[%c0_14, %c0_15] : memref<1x32xf32, #tpu.memory_space<vmem>>, vector<1x32xf32>
    %18 = vector.broadcast %17 : vector<1x32xf32> to vector<48x32xf32>
    %19 = arith.addf %16, %18 : vector<48x32xf32>
    %cst_16 = arith.constant 0.000000e+00 : f32
    %20 = vector.broadcast %cst_16 : f32 to vector<48x32xf32>
    %21 = arith.maximumf %19, %20 : vector<48x32xf32>
    %22 = tpu.iota {dimensions = array<i32: 0>} : vector<48x1xi32>
    %c48_i32 = arith.constant 48 : i32
    %23 = arith.muli %arg0, %c48_i32 : i32
    %c40_i32 = arith.constant 40 : i32
    %24 = arith.subi %c40_i32, %23 : i32
    %25 = vector.broadcast %24 : i32 to vector<48x1xi32>
    %26 = arith.cmpi slt, %22, %25 : vector<48x1xi32>
    %c0_17 = arith.constant 0 : index
    %c0_18 = arith.constant 0 : index
    %27 = vector.load %arg3[%c0_17, %c0_18] : memref<48x1xi32, #tpu.memory_space<vmem>>, vector<48x1xi32>
    %c0_i32 = arith.constant 0 : i32
    %28 = vector.broadcast %c0_i32 : i32 to vector<48x1xi32>
    %29 = arith.cmpi eq, %27, %28 : vector<48x1xi32>
    %30 = arith.andi %26, %29 : vector<48x1xi1>
    %cst_19 = arith.constant 0xFF800000 : f32
    %31 = vector.shape_cast %30 : vector<48x1xi1> to vector<48x1xi1>
    %32 = vector.broadcast %31 : vector<48x1xi1> to vector<48x32xi1>
    %33 = vector.broadcast %cst_19 : f32 to vector<48x32xf32>
    %34 = arith.select %32, %21, %33 : vector<48x32xi1>, vector<48x32xf32>
    %cst_20 = arith.constant dense<0xFF800000> : vector<32xf32>
    %35 = vector.multi_reduction <maximumf>, %34, %cst_20 [0] : vector<48x32xf32> to vector<32xf32>
    %36 = vector.shape_cast %35 : vector<32xf32> to vector<1x32xf32>
    %c0_21 = arith.constant 0 : index
    %c0_22 = arith.constant 0 : index
    %c0_23 = arith.constant 0 : index
    %37 = vector.load %arg9[%c0_21, %c0_22, %c0_23] : memref<1x2x32xf32, #tpu.memory_space<vmem>>, vector<1x1x32xf32>
    %38 = vector.shape_cast %37 : vector<1x1x32xf32> to vector<1x32xf32>
    %39 = vector.shape_cast %36 : vector<1x32xf32> to vector<1x1x32xf32>
    tpu.vector_store %arg9[%c0_21, %c0_22, %c0_23], %39 {strides = array<i32>} : memref<1x2x32xf32, #tpu.memory_space<vmem>>, vector<1x1x32xf32>,
    %c1_i32 = arith.constant 1 : i32
    %40 = vector.broadcast %c1_i32 : i32 to vector<48x1xi32>
    %41 = arith.cmpi eq, %27, %40 : vector<48x1xi32>
    %42 = arith.andi %26, %41 : vector<48x1xi1>
    %cst_24 = arith.constant 0xFF800000 : f32
    %43 = vector.shape_cast %42 : vector<48x1xi1> to vector<48x1xi1>
    %44 = vector.broadcast %43 : vector<48x1xi1> to vector<48x32xi1>
    %45 = vector.broadcast %cst_24 : f32 to vector<48x32xf32>
    %46 = arith.select %44, %21, %45 : vector<48x32xi1>, vector<48x32xf32>
    %cst_25 = arith.constant dense<0xFF800000> : vector<32xf32>
    %47 = vector.multi_reduction <maximumf>, %46, %cst_25 [0] : vector<48x32xf32> to vector<32xf32>
    %48 = vector.shape_cast %47 : vector<32xf32> to vector<1x32xf32>
    %c0_26 = arith.constant 0 : index
    %c1 = arith.constant 1 : index
    %c0_27 = arith.constant 0 : index
    %49 = vector.load %arg9[%c0_26, %c1, %c0_27] : memref<1x2x32xf32, #tpu.memory_space<vmem>>, vector<1x1x32xf32>
    %50 = vector.shape_cast %49 : vector<1x1x32xf32> to vector<1x32xf32>
    %51 = vector.shape_cast %48 : vector<1x32xf32> to vector<1x1x32xf32>
    tpu.vector_store %arg9[%c0_26, %c1, %c0_27], %51 {strides = array<i32>} : memref<1x2x32xf32, #tpu.memory_space<vmem>>, vector<1x1x32xf32>,
    return
  }
  func.func @transform_0(%arg0: i32) -> (i32, i32) {
    %c0_i32 = arith.constant 0 : i32
    %c0_i32_0 = arith.constant 0 : i32
    return %arg0, %c0_i32 : i32, i32
  }
  func.func @transform_1(%arg0: i32) -> (i32, i32) {
    %c0_i32 = arith.constant 0 : i32
    %c0_i32_0 = arith.constant 0 : i32
    return %arg0, %c0_i32 : i32, i32
  }
  func.func @transform_2(%arg0: i32) -> (i32, i32) {
    %c0_i32 = arith.constant 0 : i32
    %c0_i32_0 = arith.constant 0 : i32
    return %arg0, %c0_i32 : i32, i32
  }
  func.func @transform_3(%arg0: i32) -> (i32, i32) {
    %c0_i32 = arith.constant 0 : i32
    %c0_i32_0 = arith.constant 0 : i32
    %c0_i32_1 = arith.constant 0 : i32
    return %c0_i32, %c0_i32_0 : i32, i32
  }
  func.func @transform_4(%arg0: i32) -> (i32, i32) {
    %c0_i32 = arith.constant 0 : i32
    %c0_i32_0 = arith.constant 0 : i32
    %c0_i32_1 = arith.constant 0 : i32
    return %c0_i32, %c0_i32_0 : i32, i32
  }
  func.func @transform_5(%arg0: i32) -> (i32, i32) {
    %c0_i32 = arith.constant 0 : i32
    %c0_i32_0 = arith.constant 0 : i32
    %c0_i32_1 = arith.constant 0 : i32
    return %c0_i32, %c0_i32_0 : i32, i32
  }
  func.func @transform_6(%arg0: i32) -> (i32, i32) {
    %c0_i32 = arith.constant 0 : i32
    %c0_i32_0 = arith.constant 0 : i32
    %c0_i32_1 = arith.constant 0 : i32
    return %c0_i32, %c0_i32_0 : i32, i32
  }
  func.func @transform_7(%arg0: i32) -> (i32, i32) {
    %c0_i32 = arith.constant 0 : i32
    %c0_i32_0 = arith.constant 0 : i32
    %c0_i32_1 = arith.constant 0 : i32
    return %c0_i32, %c0_i32_0 : i32, i32
  }
  func.func @transform_8(%arg0: i32) -> (i32, i32, i32) {
    %c0_i32 = arith.constant 0 : i32
    %c0_i32_0 = arith.constant 0 : i32
    %c0_i32_1 = arith.constant 0 : i32
    return %arg0, %c0_i32, %c0_i32_0 : i32, i32, i32
  }
}

</mosaic_0001>

<bundles_post_ra>
// kernel: tpu_custom_call.1
= control target key start
LH: loop header
LB: loop body
LE: loop exit
PB: predicated region body
PF: predicated region fallthrough
CT: control target
= control target key end

     0   :  { %vm61_vm0 = vcmask 1040384   ;;  %vm62_vm1 = vcmask 1041408   ;;  %v592_v1 = vmov 0.0   ;;  %v593_v2 = vmov 65535   ;;  %s768_s0 = inlined_call_operand.vmem [shape: f32[40,4], index: 0, kind: input, shape index: {}]   ;;  %s769_s1 = inlined_call_operand.vmem [shape: f32[40,3], index: 1, kind: input, shape index: {}]   ;;  %s770_s2 = inlined_call_operand.vmem [shape: s32[40,1], index: 2, kind: input, shape index: {}]   ;;  %s771_s3 = inlined_call_operand.vmem [shape: bf16[4,32], index: 3, kind: input, shape index: {}]   ;;  %s772_s4 = inlined_call_operand.vmem [shape: bf16[3,32], index: 4, kind: input, shape index: {}]   ;;  %s773_s5 = inlined_call_operand.vmem [shape: f32[1,32], index: 5, kind: input, shape index: {}]   ;;  %s774_s6 = inlined_call_operand.vmem [shape: bf16[32,32], index: 6, kind: input, shape index: {}]   ;;  %s775_s7 = inlined_call_operand.vmem [shape: f32[1,32], index: 7, kind: input, shape index: {}]   ;;  %s776_s8 = inlined_call_operand.hbm [shape: f32[1,2,32], index: 8, kind: output, shape index: {}]  }
   0x1   :  { %v50_v0 = vld [vmem:[%s772_s4] sm:$0x3]  ;;  %552 = vmatprep.subr.bf16.mxu1 %v592_v1  ;;  %v63_v3 = vsel %vm61_vm0, 4294967295, %v593_v2  ;;  %v42_v4 = vld [vmem:[%s769_s1 + $0x10] sm:$0xff]  ;;  %v43_v5 = vld [vmem:[%s769_s1 + $0x18] sm:$0xff]  ;;  %508 = vmatprep.subr.bf16.mxu0 %v592_v1  ;;  %vm594_vm2 = vmmov 0  }
   0x2   :  { %v64_v6 = vsel %vm62_vm1, %v63_v3, 0  ;;  %514 = vmatprep.mubr.msk.bf16.mxu1 %vm594_vm2, %v592_v1  ;;  %v49_v7 = vld [vmem:[%s771_s3] sm:$0x3]  ;;  %510 = vmatprep.mubr.msk.bf16.mxu0 %vm594_vm2, %v592_v1  ;;  %v41_v10 = vld [vmem:[%s769_s1 + $0x8] sm:$0xff]  ;;  %v47_v11 = vpack.c.bf16 %v43_v5, %v42_v4  ;;  %vm51_vm3 = vcmask 23552  }
   0x3   :  { %v40_v8 = vld [vmem:[%s769_s1] sm:$0xff]  ;;  %v66_v9 = vand.u32 %v64_v6, %v50_v0  ;;  %v136_v13 = vsel %vm62_vm1, %v49_v7, 0 }
   0x4   :  { %v46_v12 = vpack.c.bf16 %v41_v10, %v40_v8 }
   0x5   :  { %553 = vmatpush3.bf16.msra.mxu1 %v66_v9  ;;  %509 = vmatpush3.bf16.msra.mxu0 %v66_v9 }
   0x6   :  { %522 = vmatprep.subr.bf16.mxu1 %v592_v1  ;;  %536 = vmatprep.subr.bf16.mxu0 %v592_v1 }
   0x7   :  { %13 = vsyncpa [#allocation3], 0  ;;  %v44_v14 = vld [vmem:[%s769_s1 + $0x20] sm:$0xff]  ;;  %v45_v15 = vld [vmem:[%s769_s1 + $0x28] sm:$0xff]  ;;  %vm125_vm4 = vcmask 31744   ;;  %v595_v31 = vmov 0  }
   0x8   :  { %515 = vmatmul.mubr.msk.bf16.vlgmr.msra.gmra.mrb[0].mxu1 %vm51_vm3, %v47_v11  ;;  %511 = vmatmul.mubr.msk.bf16.vlgmr.msra.gmra.mrb[0].mxu0 %vm51_vm3, %v46_v12  ;;  %v48_v16 = vpack.c.bf16 %v45_v15, %v44_v14  ;;  %v31_v17 = vld [vmem:[%s768_s0] sm:$0xff]  ;;  %v32_v18 = vld [vmem:[%s768_s0 + $0x8] sm:$0xff]  ;;  %v33_v20 = vld [vmem:[%s768_s0 + $0x10] sm:$0xff]  ;;  %vm240_vm15 = vcmask 261120  }
   0x9   :  { %523 = vmatpush3.bf16.msra.mxu1 %v136_v13  ;;  %518 = vmatprep.mubr.msk.bf16.mxu1 %vm594_vm2, %v592_v1  ;;  %v37_v19 = vpack.c.bf16 %v32_v18, %v31_v17  ;;  %v34_v21 = vld [vmem:[%s768_s0 + $0x18] sm:$0xff]  ;;  %v35_v23 = vld [vmem:[%s768_s0 + $0x20] sm:$0xff]  ;;  %v36_v24 = vld [vmem:[%s768_s0 + $0x28] sm:$0xff] }
   0xa   :  { %540 = vmatprep.mubr.msk.bf16.mxu0 %vm594_vm2, %v592_v1  ;;  %v38_v22 = vpack.c.bf16 %v34_v21, %v33_v20  ;;  %v39_v25 = vpack.c.bf16 %v36_v24, %v35_v23  ;;  %v566_v26 = vld [vmem:[%s774_s6] sm:$0xff]   ;;  %v567_v27 = vld [vmem:[%s774_s6 + $0x8] sm:$0xff]   ;;  %559 = vset.pattern.permute.xlu0 %v595_v31  ;;  %v331_v35 = vld [vmem:[%s770_s2 + $0x10] sm:$0xff] }
   0xb   :  { %537 = vmatpush3.bf16.msra.mxu0 %v566_v26  ;;  %v329_v28 = vld [vmem:[%s770_s2] sm:$0xff]  ;;  %v330_v29 = vld [vmem:[%s770_s2 + $0x8] sm:$0xff]  ;;  %560 = vset.pattern.permute.xlu1 %v595_v31  ;;  %vm337_vm11 = vcmp.eq.s32.totalorder %v331_v35, 0  ;;  %v332_v38 = vld [vmem:[%s770_s2 + $0x18] sm:$0xff]  ;;  %vm404_vm13 = vcmp.eq.s32.totalorder %v331_v35, 1 }
   0xc   :  { %538 = vmatprep.subr.bf16.mxu0 %v592_v1  ;;  %v333_v30 = vld [vmem:[%s770_s2 + $0x20] sm:$0xff]  ;;  %vm335_vm5 = vcmp.eq.s32.totalorder %v329_v28, 0  ;;  %vm336_vm6 = vcmp.eq.s32.totalorder %v330_v29, 0  ;;  %vm402_vm8 = vcmp.eq.s32.totalorder %v329_v28, 1  ;;  %vm403_vm9 = vcmp.eq.s32.totalorder %v330_v29, 1 }
   0xd   :  { %vm339_vm7 = vcmp.eq.s32.totalorder %v333_v30, 0  ;;  %v347_v32 = vsel %vm335_vm5, 1, %v595_v31  ;;  %v348_v34 = vsel %vm336_vm6, 1, %v595_v31  ;;  %v414_v36 = vsel %vm402_vm8, 1, %v595_v31  ;;  %v488_v57 = vld [vmem:[%s773_s5] ss:$0 sm:$0xff] }
   0xe   :  { %v351_v33 = vsel %vm339_vm7, 1, %v595_v31  ;;  %354 = vperm.xlu0 %559, %v347_v32   ;;  %v415_v37 = vsel %vm403_vm9, 1, %v595_v31  ;;  %vm406_vm10 = vcmp.eq.s32.totalorder %v333_v30, 1  ;;  %v349_v40 = vsel %vm337_vm11, 1, %v595_v31 }
   0xf   :  { %539 = vmatpush3.bf16.msra.mxu0 %v567_v27  ;;  %366 = vperm.xlu1 %560, %v351_v33   ;;  %v418_v39 = vsel %vm406_vm10, 1, %v595_v31  ;;  %vm338_vm12 = vcmp.eq.s32.totalorder %v332_v38, 0  ;;  %v416_v42 = vsel %vm404_vm13, 1, %v595_v31  ;;  %vm405_vm14 = vcmp.eq.s32.totalorder %v332_v38, 1 }
  0x10   :  { %519 = vmatmul.mubr.msk.bf16.gmra.mrb[4].mxu1 %vm51_vm3, %v48_v16  ;;  %v350_v41 = vsel %vm338_vm12, 1, %v595_v31  ;;  %v417_v43 = vsel %vm405_vm14, 1, %v595_v31  ;;  %vm400_vm12 = vcmask 253952  }
  0x11   :  { %524 = vmatprep.mubr.msk.bf16.mxu1 %vm594_vm2, %v592_v1 }
  0x12   :  { %357 = vperm.xlu0 %559, %v348_v34  }
  0x13   :  { %562 = vperm.xlu1 %560, %v595_v31  }
  0x16   :  { %421 = vperm.xlu0 %559, %v414_v36  }
  0x17   :  { %424 = vperm.xlu1 %560, %v415_v37  }
  0x18   :  { %525 = vmatmul.mubr.msk.bf16.vlgmr.msra.gmra.mrb[8].mxu1 %vm125_vm4, %v37_v19 }
  0x19   :  { %528 = vmatprep.mubr.msk.bf16.mxu1 %vm594_vm2, %v592_v1 }
  0x1a   :  { %433 = vperm.xlu0 %559, %v418_v39   ;;  %v489_v39 = vld [vmem:[%s775_s7] ss:$0 sm:$0xff]  ;;  %s596_s7 = smov [#allocation2]  }
  0x1b   :  { %360 = vperm.xlu1 %560, %v349_v40   ;;  %s474_s20 = sshll.u32 %s596_s7, 4  ;;  %s475_s20 = int_to_ptr.vmem [resolvable:$true] %s474_s20 }
  0x1c   :  { %s568_s21 = scalar_lea.vmem %s475_s20, 32  ;;  %p573_p1 = scmp.lt.s32.totalorder %s475_s20, %s475_s20 }
  0x1d   :  { %p569_p0 = scmp.ne.s32.totalorder %s475_s20, %s568_s21  ;;  %p574_p2 = scmp.lt.s32.totalorder %s568_s21, %s568_s21 }
  0x1e   :  { %363 = vperm.xlu0 %559, %v350_v41  }
  0x1f   :  { %427 = vperm.xlu1 %560, %v416_v42   ;;  %p575_p3 = por %p574_p2, %p573_p1 }
  0x20   :  { %529 = vmatmul.mubr.msk.bf16.gmra.mrb[12].mxu1 %vm125_vm4, %v38_v22 }
  0x21   :  { %532 = vmatprep.mubr.msk.bf16.mxu1 %vm594_vm2, %v592_v1  ;;  %p576_p4 = pnand %p575_p3, %p569_p0 }
  0x22   :  { %430 = vperm.xlu0 %559, %v417_v43  }
  0x28   :  { %533 = vmatmul.mubr.msk.bf16.gmra.mrb[16].mxu1 %vm125_vm4, %v39_v25 }
  0x8d   :  { %v355_v27 = vpop.permute.xlu0 %354 }
  0x8e   :  { %v736_v28 = vpop.permute.xlu1 %366  ;;  %vm371_vm0 = vcmp.eq.s32.totalorder %v355_v27, 1 }
  0x8f   :  { %vm375_vm7 = vcmp.eq.s32.totalorder %v736_v28, 1 }
  0x91   :  { %v358_v29 = vpop.permute.xlu0 %357 }
  0x92   :  { %v563_v30 = vpop.permute.xlu1 %562  ;;  %vm372_vm6 = vcmp.eq.s32.totalorder %v358_v29, 1 }
  0x95   :  { %v422_v31 = vpop.permute.xlu0 %421 }
  0x96   :  { %v425_v32 = vpop.permute.xlu1 %424  ;;  %vm438_vm3 = vcmp.eq.s32.totalorder %v422_v31, 1 }
  0x97   :  { %vm439_vm8 = vcmp.eq.s32.totalorder %v425_v32, 1 }
  0x99   :  { %v434_v33 = vpop.permute.xlu0 %433 }
  0x9a   :  { %v361_v38 = vpop.permute.xlu1 %360  ;;  %vm442_vm11 = vcmp.eq.s32.totalorder %v434_v33, 1 }
  0x9b   :  { %vm373_vm1 = vcmp.eq.s32.totalorder %v361_v38, 1 }
  0x9e   :  { %v428_v41 = vpop.permute.xlu1 %427 }
  0xdb   :  { %v110_v44 = vpop.f32.mrb[0].mxu1  ;;  %v102_v45 = vpop.f32.mrb[0].mxu0 }
  0xdc   :  { %v516_v46 = vpop.f32.mrb[1].mxu1  ;;  %v512_v47 = vpop.f32.mrb[1].mxu0 }
  0xdd   :  { %v113_v48 = vpop.f32.mrb[2].mxu1  ;;  %v105_v49 = vpop.f32.mrb[2].mxu0 }
  0xde   :  { %v517_v50 = vpop.f32.mrb[3].mxu1  ;;  %v513_v51 = vpop.f32.mrb[3].mxu0 }
  0xdf   :  { %v565_v51 = vunpack.i.h.bf16 %v563_v30 }
  0xe1   :  { %vm443_vm9 = vcmp.eq.s32.totalorder %v565_v51, 1 }
  0xe3   :  { %v118_v52 = vpop.f32.mrb[4].mxu1 }
  0xe4   :  { %v520_v53 = vpop.f32.mrb[5].mxu1 }
  0xe5   :  { %v121_v54 = vpop.f32.mrb[6].mxu1 }
  0xe6   :  { %v521_v55 = vpop.f32.mrb[7].mxu1 }
  0xe7   :  { %v564_v55 = vunpack.i.l.bf16 %v563_v30 }
  0xe9   :  { %vm376_vm10 = vcmp.eq.s32.totalorder %v564_v55, 1 }
  0xeb   :  { %v172_v56 = vpop.f32.mrb[8].mxu1 }
  0xec   :  { %v173_v58 = vadd.f32 %v172_v56, %v102_v45  ;;  %v526_v59 = vpop.f32.mrb[9].mxu1 }
  0xed   :  { %v175_v60 = vpop.f32.mrb[10].mxu1 }
  0xee   :  { %v202_v61 = vadd.f32 %v488_v57, %v173_v58  ;;  %v176_v62 = vadd.f32 %v175_v60, %v105_v49  ;;  %v527_v63 = vpop.f32.mrb[11].mxu1 }
  0xf0   :  { %v203_v0 = vadd.f32 %v488_v57, %v176_v62  ;;  %v208_v2 = vmax.f32 %v202_v61, 0.0 }
  0xf2   :  { %v209_v3 = vmax.f32 %v203_v0, 0.0 }
  0xf3   :  { %v180_v4 = vpop.f32.mrb[12].mxu1 }
  0xf4   :  { %v214_v5 = vpack.c.bf16 %v209_v3, %v208_v2  ;;  %v181_v6 = vadd.f32 %v180_v4, %v110_v44  ;;  %v530_v7 = vpop.f32.mrb[13].mxu1 }
  0xf5   :  { %v183_v8 = vpop.f32.mrb[14].mxu1 }
  0xf6   :  { %v204_v9 = vadd.f32 %v488_v57, %v181_v6  ;;  %v184_v10 = vadd.f32 %v183_v8, %v113_v48  ;;  %v531_v11 = vpop.f32.mrb[15].mxu1  ;;  %541 = vmatmul.mubr.msk.bf16.vlgmr.msra.gmra.mrb[4].mxu0 %vm240_vm15, %v214_v5 }
  0xf7   :  { %544 = vmatprep.mubr.msk.bf16.mxu0 %vm594_vm2, %v592_v1 }
  0xf8   :  { %v205_v12 = vadd.f32 %v488_v57, %v184_v10  ;;  %v210_v13 = vmax.f32 %v204_v9, 0.0 }
  0xfa   :  { %v211_v14 = vmax.f32 %v205_v12, 0.0 }
  0xfb   :  { %v188_v15 = vpop.f32.mrb[16].mxu1 }
  0xfc   :  { %v215_v16 = vpack.c.bf16 %v211_v14, %v210_v13  ;;  %v189_v17 = vadd.f32 %v188_v15, %v118_v52  ;;  %v534_v18 = vpop.f32.mrb[17].mxu1 }
  0xfd   :  { %v191_v19 = vpop.f32.mrb[18].mxu1 }
  0xfe   :  { %v206_v20 = vadd.f32 %v488_v57, %v189_v17  ;;  %v192_v21 = vadd.f32 %v191_v19, %v121_v54  ;;  %v535_v22 = vpop.f32.mrb[19].mxu1  ;;  %545 = vmatmul.mubr.msk.bf16.gmra.mrb[8].mxu0 %vm240_vm15, %v215_v16 }
  0xff   :  { %548 = vmatprep.mubr.msk.bf16.mxu0 %vm594_vm2, %v592_v1  ;;  %v364_v1 = vpop.permute.xlu0 %363  ;;  %vm440_vm2 = vcmp.eq.s32.totalorder %v428_v41, 1 }
 0x100   :  { %v207_v23 = vadd.f32 %v488_v57, %v192_v21  ;;  %v212_v24 = vmax.f32 %v206_v20, 0.0  ;;  %vm374_vm4 = vcmp.eq.s32.totalorder %v364_v1, 1 }
 0x102   :  { %v213_v25 = vmax.f32 %v207_v23, 0.0 }
 0x103   :  { %v431_v47 = vpop.permute.xlu0 %430 }
 0x104   :  { %v216_v26 = vpack.c.bf16 %v213_v25, %v212_v24  ;;  %vm441_vm5 = vcmp.eq.s32.totalorder %v431_v47, 1 }
 0x106   :  { %549 = vmatmul.mubr.msk.bf16.gmra.mrb[12].mxu0 %vm240_vm15, %v216_v26 }
 0x1c9   :  { %v284_v34 = vpop.f32.mrb[4].mxu0 }
 0x1ca   :  { %v542_v35 = vpop.f32.mrb[5].mxu0  ;;  %v285_v45 = vadd.f32 %v489_v39, %v284_v34 }
 0x1cb   :  { %v287_v36 = vpop.f32.mrb[6].mxu0 }
 0x1cc   :  { %v543_v37 = vpop.f32.mrb[7].mxu0  ;;  %v288_v46 = vadd.f32 %v489_v39, %v287_v36  ;;  %v307_v56 = vmax.f32 %v285_v45, 0.0 }
 0x1ce   :  { %v308_v57 = vmax.f32 %v288_v46, 0.0  ;;  %v377_v7 = vsel %vm371_vm0, %v307_v56, -inf  ;;  %v444_v8 = vsel %vm438_vm3, %v307_v56, -inf }
 0x1cf   :  { %v383_v17 = vsel %vm240_vm15, %v377_v7, -inf  ;;  %v450_v18 = vsel %vm240_vm15, %v444_v8, -inf }
 0x1d0   :  { %v378_v12 = vsel %vm372_vm6, %v308_v57, -inf  ;;  %v445_v13 = vsel %vm439_vm8, %v308_v57, -inf }
 0x1d1   :  { %v292_v40 = vpop.f32.mrb[8].mxu0  ;;  %v384_v25 = vsel %vm240_vm15, %v378_v12, -inf  ;;  %v451_v26 = vsel %vm240_vm15, %v445_v13, -inf }
 0x1d2   :  { %v293_v42 = vadd.f32 %v489_v39, %v292_v40  ;;  %v546_v43 = vpop.f32.mrb[9].mxu0 }
 0x1d3   :  { %v295_v44 = vpop.f32.mrb[10].mxu0 }
 0x1d4   :  { %v309_v48 = vmax.f32 %v293_v42, 0.0  ;;  %v296_v49 = vadd.f32 %v489_v39, %v295_v44  ;;  %v547_v50 = vpop.f32.mrb[11].mxu0 }
 0x1d6   :  { %v379_v52 = vsel %vm373_vm1, %v309_v48, -inf  ;;  %v446_v53 = vsel %vm440_vm2, %v309_v48, -inf  ;;  %v310_v54 = vmax.f32 %v296_v49, 0.0 }
 0x1d7   :  { %v385_v60 = vsel %vm240_vm15, %v379_v52, -inf  ;;  %v452_v61 = vsel %vm240_vm15, %v446_v53, -inf }
 0x1d8   :  { %v380_v58 = vsel %vm374_vm4, %v310_v54, -inf  ;;  %v447_v59 = vsel %vm441_vm5, %v310_v54, -inf }
 0x1d9   :  { %v386_v62 = vsel %vm240_vm15, %v380_v58, -inf  ;;  %v453_v63 = vsel %vm240_vm15, %v447_v59, -inf  ;;  %v300_v0 = vpop.f32.mrb[12].mxu0 }
 0x1da   :  { %v392_v2 = vmax.f32 %v385_v60, %v386_v62  ;;  %v459_v3 = vmax.f32 %v452_v61, %v453_v63  ;;  %v301_v4 = vadd.f32 %v489_v39, %v300_v0  ;;  %v550_v5 = vpop.f32.mrb[13].mxu0 }
 0x1db   :  { %v303_v6 = vpop.f32.mrb[14].mxu0 }
 0x1dc   :  { %v311_v9 = vmax.f32 %v301_v4, 0.0  ;;  %v304_v10 = vadd.f32 %v489_v39, %v303_v6  ;;  %v551_v11 = vpop.f32.mrb[15].mxu0 }
 0x1de   :  { %v381_v14 = vsel %vm375_vm7, %v311_v9, -inf  ;;  %v448_v15 = vsel %vm442_vm11, %v311_v9, -inf  ;;  %v312_v16 = vmax.f32 %v304_v10, 0.0 }
 0x1df   :  { %v387_v19 = vsel %vm240_vm15, %v381_v14, -inf  ;;  %v454_v20 = vsel %vm240_vm15, %v448_v15, -inf }
 0x1e0   :  { %v388_v21 = vmax.f32 %v383_v17, %v387_v19  ;;  %v455_v22 = vmax.f32 %v450_v18, %v454_v20  ;;  %v382_v23 = vsel %vm376_vm10, %v312_v16, -inf  ;;  %v449_v24 = vsel %vm443_vm9, %v312_v16, -inf }
 0x1e1   :  { %v389_v27 = vsel %vm240_vm15, %v382_v23, -inf  ;;  %v456_v28 = vsel %vm240_vm15, %v449_v24, -inf }
 0x1e2   :  { %v390_v29 = vmax.f32 %v384_v25, %v389_v27  ;;  %v457_v30 = vmax.f32 %v451_v26, %v456_v28 }
 0x1e4   :  { %v391_v31 = vmax.f32 %v388_v21, %v390_v29  ;;  %v458_v32 = vmax.f32 %v455_v22, %v457_v30 }
 0x1e6   :  { %v393_v33 = vmax.f32 %v391_v31, %v392_v2  ;;  %v460_v34 = vmax.f32 %v458_v32, %v459_v3 }
 0x1e8   :  { %v394_v35 = vrot.slane %v393_v33, 4  ;;  %v461_v36 = vrot.slane %v460_v34, 4 }
 0x1ea   :  { %v395_v37 = vmax.f32 %v393_v33, %v394_v35  ;;  %v462_v38 = vmax.f32 %v460_v34, %v461_v36 }
 0x1ec   :  { %v396_v1 = vrot.slane %v395_v37, 2  ;;  %v463_v39 = vrot.slane %v462_v38, 2 }
 0x1ee   :  { %v397_v40 = vmax.f32 %v395_v37, %v396_v1  ;;  %v464_v41 = vmax.f32 %v462_v38, %v463_v39 }
 0x1f0   :  { %v398_v42 = vrot.slane %v397_v40, 1  ;;  %v465_v43 = vrot.slane %v464_v41, 1 }
 0x1f2   :  { %v399_v44 = vmax.f32 %v397_v40, %v398_v42  ;;  %v466_v45 = vmax.f32 %v464_v41, %v465_v43 }
 0x1f4   :  { %401 = vst.msk [vmem:[#allocation2] sm:$0x1] %vm400_vm12, %v399_v44  ;;  %467 = vst.msk [vmem:[#allocation2 + $0x1] sm:$0x1] %vm400_vm12, %v466_v45 }
 0x1f5   :  { %579 = shalt.err (!%p576_p4)
}
 0x1f6   :  { %s580_s23 = scalar_lea.hbm %s776_s8, 32 }
 0x1f7   :  { %p581_p5 = scmp.ne.s32.totalorder %s776_s8, %s580_s23  ;;  %p584_p6 = scmp.lt.u32.totalorder %s580_s23, %s776_s8 }
 0x1f9   :  { %p586_p7 = pnand %p584_p6, %p581_p5 }
 0x1fb   :  { %589 = shalt.err (!%p586_p7)
}
 0x1fc   :  { %477 = dma.vmem_to_hbm [thread:$0]  %s475_s20, 32, %s776_s8, [#allocation3]  }
 0x1fd   :  { %590 = dma.done.wait [#allocation3], 32  }
 0x1fe   :  { %591 = vsyncadd [#allocation3], 4294967264 }
 0x1ff   :  { %481 = vsyncpa [#allocation3], 1 }

</bundles_post_ra>
